<compile_context>
chip_gen: v7x
topology: tpu7x:2x2x1
jax: 0.10.0
libtpu: 0.0.40
codegen_flags: <defaults>
</compile_context>

<pallas_src>
import functools

import jax
import jax.numpy as jnp
from jax.experimental import pallas as pl
from jax.experimental.pallas import tpu as pltpu

LANES = 128
SUBLANES = 8
_TARGET_TILE_BYTES = 4 * 1024 * 1024   # per-input tile; amortizes per-step overhead
_VMEM_LIMIT_BYTES = 48 * 1024 * 1024   # < 64 MiB physical (v7x), > 16 MiB default (v5e)


def _round_up(x, m):
    return (x + m - 1) // m * m


def _default_num_cores():
    """2 TensorCores on megacore / dual-TC parts (v4, v5p, v7x); 1 elsewhere."""
    try:
        kind = jax.devices()[0].device_kind.lower()
    except Exception:
        return 1
    if any(tag in kind for tag in ("v4", "v5p", "v7", "7x")):
        return 2
    return 1


def _simse_kernel(pred_ref, real_ref, out_ref, acc_ref, *,
                  rows_valid, tile_rows, tiles_per_core, needs_mask):
    c = pl.program_id(0)
    i = pl.program_id(1)

    @pl.when(i == 0)
    def _():
        acc_ref[...] = jnp.zeros_like(acc_ref)

    # Hot path: native-dtype load -> f32 upcast -> vsub -> vadd (VPU only).
    diff = real_ref[...].astype(jnp.float32) - pred_ref[...].astype(jnp.float32)

    def _accumulate(d):
        # Fold the tile into an (8, 128) vector accumulator (pure vector adds).
        acc_ref[...] += d.reshape(-1, SUBLANES, LANES).sum(axis=0)

    if needs_mask:
        # Mask is hoisted off the hot path: only true edge / over-cover tiles
        # pay for the iota/compare/where.  (Pallas pads -- does not shift --
        # partial edge blocks, so rows past `rows_valid` hold garbage and must
        # be zeroed; fully clamped duplicate tiles have rows_left <= 0 and
        # contribute nothing.)
        base = (c * tiles_per_core + i) * tile_rows
        is_interior = base + tile_rows <= rows_valid

        @pl.when(is_interior)
        def _():
            _accumulate(diff)

        @pl.when(jnp.logical_not(is_interior))
        def _():
            rows_left = rows_valid - base  # scalar; base-free iota below
            row_ids = jax.lax.broadcasted_iota(jnp.int32, (tile_rows, LANES), 0)
            _accumulate(jnp.where(row_ids < rows_left, diff, 0.0))
    else:
        _accumulate(diff)

    @pl.when(i == pl.num_programs(1) - 1)
    def _():
        # Single cross-lane/sublane reduce per core, done once in the epilogue.
        out_ref[...] = jnp.sum(acc_ref[...]).reshape(1, 1, 1)


def simse(pred, real, *, tile_rows=None, num_cores=None):
    assert pred.shape == real.shape
    n = pred.size
    if num_cores is None:
        num_cores = _default_num_cores()

    # Flatten in native dtype (no f32 pre-cast; the kernel upcasts on the fly).
    flat_p = pred.reshape(-1)
    flat_r = real.reshape(-1)

    # Ragged n: sum the sub-128 tail in plain JAX so the kernel only ever sees
    # a lane-aligned slab (avoids the jnp.pad full-array copy).
    rem = n % LANES
    tail = jnp.float32(0.0)
    if rem:
        # TODO(synk): for very large ragged inputs the prefix slice below may
        # itself materialize; an in-kernel ragged lane mask would be copy-free.
        aligned = n - rem
        tail = jnp.sum(flat_r[aligned:].astype(jnp.float32)
                       - flat_p[aligned:].astype(jnp.float32))
        flat_p = flat_p[:aligned]
        flat_r = flat_r[:aligned]

    rows = flat_p.size // LANES
    if rows == 0:
        t = tail * jnp.float32(1.0 / n)
        return t * t

    p2d = flat_p.reshape(rows, LANES)   # free reshape (row-major contiguous)
    r2d = flat_r.reshape(rows, LANES)

    # Tile sizing by bytes (bf16 gets 2x the rows of f32 for the same VMEM):
    # 4 MiB per input per step keeps the ~0.35 us grid-step overhead to a
    # small fraction of the DMA time on every generation, incl. v7x HBM.
    itemsize = jnp.dtype(p2d.dtype).itemsize
    if tile_rows is None:
        tile_rows = max(SUBLANES, _TARGET_TILE_BYTES // (LANES * itemsize))
    rows8 = _round_up(rows, SUBLANES)
    tr = max(SUBLANES, min(_round_up(tile_rows, SUBLANES), rows8))

    num_tiles = pl.cdiv(rows, tr)
    tiles_per_core = pl.cdiv(num_tiles, num_cores)

    # If the rectangular (num_cores, tiles_per_core) grid over-covers the slab,
    # clamp edge block indices in-bounds; masking (runtime-gated to edge tiles
    # only) zeroes their contribution.
    needs_clamp = num_cores * tiles_per_core != num_tiles
    needs_mask = num_cores * tiles_per_core * tr != rows
    if needs_clamp:
        def in_map(c, i):
            return (jnp.minimum(c * tiles_per_core + i, num_tiles - 1), 0)
    else:
        def in_map(c, i):
            return (c * tiles_per_core + i, 0)

    kernel = functools.partial(
        _simse_kernel,
        rows_valid=rows,
        tile_rows=tr,
        tiles_per_core=tiles_per_core,
        needs_mask=needs_mask,
    )

    partials = pl.pallas_call(
        kernel,
        out_shape=jax.ShapeDtypeStruct((num_cores, 1, 1), jnp.float32),
        grid_spec=pltpu.PrefetchScalarGridSpec(
            num_scalar_prefetch=0,
            grid=(num_cores, tiles_per_core),
            in_specs=[
                pl.BlockSpec((tr, LANES), in_map),
                pl.BlockSpec((tr, LANES), in_map),
            ],
            out_specs=pl.BlockSpec((1, 1, 1), lambda c, i: (c, 0, 0)),
            scratch_shapes=[pltpu.VMEM((SUBLANES, LANES), jnp.float32)],
        ),
        compiler_params=pltpu.CompilerParams(
            dimension_semantics=("parallel", "arbitrary"),
            vmem_limit_bytes=_VMEM_LIMIT_BYTES,
        ),
    )(p2d, r2d)

    # Combine per-core partials + ragged tail; scale before squaring.
    t = (jnp.sum(partials) + tail) * jnp.float32(1.0 / n)
    return t * t


def simse_ref(pred, real):
    diffs = real.astype(jnp.float32) - pred.astype(jnp.float32)
    n = diffs.size
    return jnp.sum(diffs) ** 2 / float(n) ** 2


if __name__ == "__main__":
    key = jax.random.PRNGKey(0)
    k1, k2 = jax.random.split(key)
    pred = jax.random.normal(k1, (2, 4, 16, 16), dtype=jnp.float32)
    real = jax.random.normal(k2, (2, 4, 16, 16), dtype=jnp.float32)

    out = simse(pred, real)
    jax.block_until_ready(out)

    ref = simse_ref(pred, real)
    assert jnp.allclose(out, ref, rtol=1e-5, atol=1e-6), (out, ref)
    print("KERNEL_OK")
</pallas_src>

<mosaic_0001>
module attributes {stable_mosaic.version = 11 : i64} {
  func.func @_simse_kernel(%arg0: i32, %arg1: i32, %arg2: memref<16x128xf32, #tpu.memory_space<vmem>>, %arg3: memref<16x128xf32, #tpu.memory_space<vmem>>, %arg4: memref<1x1x1xf32, #tpu.memory_space<vmem>>, %arg5: memref<8x128xf32, #tpu.memory_space<vmem>>) attributes {dimension_semantics = [#tpu.dimension_semantics<parallel>, #tpu.dimension_semantics<arbitrary>], iteration_bounds = array<i64: 1, 1>, scalar_prefetch = 0 : i64, scratch_operands = 1 : i64, tpu.core_type = #tpu.core_type<tc>, window_params = [{transform_indices = @transform_0, window_bounds = array<i64: 16, 128>}, {transform_indices = @transform_1, window_bounds = array<i64: 16, 128>}, {transform_indices = @transform_2, window_bounds = array<i64: 1, 1, 1>}]} {
    %c0_i32 = arith.constant 0 : i32
    %0 = arith.cmpi eq, %arg1, %c0_i32 : i32
    %1 = arith.extui %0 : i1 to i32
    %c0_i32_0 = arith.constant 0 : i32
    %2 = arith.cmpi ne, %1, %c0_i32_0 : i32
    scf.if %2 {
      %cst_10 = arith.constant 0.000000e+00 : f32
      %14 = vector.broadcast %cst_10 : f32 to vector<8x128xf32>
      %c0_11 = arith.constant 0 : index
      %c0_12 = arith.constant 0 : index
      %15 = vector.load %arg5[%c0_11, %c0_12] : memref<8x128xf32, #tpu.memory_space<vmem>>, vector<8x128xf32>
      tpu.vector_store %arg5[%c0_11, %c0_12], %14 {strides = array<i32>} : memref<8x128xf32, #tpu.memory_space<vmem>>, vector<8x128xf32>,
    } else {
    }
    %c0 = arith.constant 0 : index
    %c0_1 = arith.constant 0 : index
    %3 = vector.load %arg3[%c0, %c0_1] : memref<16x128xf32, #tpu.memory_space<vmem>>, vector<16x128xf32>
    %c0_2 = arith.constant 0 : index
    %c0_3 = arith.constant 0 : index
    %4 = vector.load %arg2[%c0_2, %c0_3] : memref<16x128xf32, #tpu.memory_space<vmem>>, vector<16x128xf32>
    %5 = arith.subf %3, %4 : vector<16x128xf32>
    %c0_4 = arith.constant 0 : index
    %c0_5 = arith.constant 0 : index
    %6 = vector.load %arg5[%c0_4, %c0_5] : memref<8x128xf32, #tpu.memory_space<vmem>>, vector<8x128xf32>
    %7 = vector.shape_cast %5 : vector<16x128xf32> to vector<2x8x128xf32>
    %cst = arith.constant dense<0.000000e+00> : vector<8x128xf32>
    %8 = vector.multi_reduction <add>, %7, %cst [0] : vector<2x8x128xf32> to vector<8x128xf32>
    %9 = arith.addf %6, %8 : vector<8x128xf32>
    %c0_6 = arith.constant 0 : index
    %c0_7 = arith.constant 0 : index
    %10 = vector.load %arg5[%c0_6, %c0_7] : memref<8x128xf32, #tpu.memory_space<vmem>>, vector<8x128xf32>
    tpu.vector_store %arg5[%c0_6, %c0_7], %9 {strides = array<i32>} : memref<8x128xf32, #tpu.memory_space<vmem>>, vector<8x128xf32>,
    %c0_i32_8 = arith.constant 0 : i32
    %11 = arith.cmpi eq, %arg1, %c0_i32_8 : i32
    %12 = arith.extui %11 : i1 to i32
    %c0_i32_9 = arith.constant 0 : i32
    %13 = arith.cmpi ne, %12, %c0_i32_9 : i32
    scf.if %13 {
      %c0_10 = arith.constant 0 : index
      %c0_11 = arith.constant 0 : index
      %14 = vector.load %arg5[%c0_10, %c0_11] : memref<8x128xf32, #tpu.memory_space<vmem>>, vector<8x128xf32>
      %15 = vector.shape_cast %14 : vector<8x128xf32> to vector<1x8x128xf32>
      %cst_12 = arith.constant dense<0.000000e+00> : vector<1xf32>
      %16 = vector.multi_reduction <add>, %15, %cst_12 [1, 2] : vector<1x8x128xf32> to vector<1xf32>
      %17 = vector.shape_cast %16 : vector<1xf32> to vector<1x1x1xf32>
      %18 = vector.extract %17[0, 0, 0] : f32 from vector<1x1x1xf32>
      %19 = vector.broadcast %18 : f32 to vector<1x1x1xf32>
      %c0_13 = arith.constant 0 : index
      %c0_14 = arith.constant 0 : index
      %c0_15 = arith.constant 0 : index
      %20 = vector.load %arg4[%c0_13, %c0_14, %c0_15] : memref<1x1x1xf32, #tpu.memory_space<vmem>>, vector<1x1x1xf32>
      tpu.vector_store %arg4[%c0_13, %c0_14, %c0_15], %19 {strides = array<i32>} : memref<1x1x1xf32, #tpu.memory_space<vmem>>, vector<1x1x1xf32>,
    } else {
    }
    return
  }
  func.func @transform_0(%arg0: i32, %arg1: i32) -> (i32, i32) {
    %c1_i32 = arith.constant 1 : i32
    %0 = arith.muli %arg0, %c1_i32 : i32
    %1 = arith.addi %0, %arg1 : i32
    %c0_i32 = arith.constant 0 : i32
    %c0_i32_0 = arith.constant 0 : i32
    return %1, %c0_i32 : i32, i32
  }
  func.func @transform_1(%arg0: i32, %arg1: i32) -> (i32, i32) {
    %c1_i32 = arith.constant 1 : i32
    %0 = arith.muli %arg0, %c1_i32 : i32
    %1 = arith.addi %0, %arg1 : i32
    %c0_i32 = arith.constant 0 : i32
    %c0_i32_0 = arith.constant 0 : i32
    return %1, %c0_i32 : i32, i32
  }
  func.func @transform_2(%arg0: i32, %arg1: i32) -> (i32, i32, i32) {
    %c0_i32 = arith.constant 0 : i32
    %c0_i32_0 = arith.constant 0 : i32
    %c0_i32_1 = arith.constant 0 : i32
    return %arg0, %c0_i32, %c0_i32_0 : i32, i32, i32
  }
}

</mosaic_0001>

<bundles_post_ra>
// kernel: tpu_custom_call.1
= control target key start
LH: loop header
LB: loop body
LE: loop exit
PB: predicated region body
PF: predicated region fallthrough
CT: control target
= control target key end

     0   :  { %7 = vsyncpa [#allocation4], 0  ;;  %s234_s0 = inlined_call_operand.hbm [shape: f32[16,128], index: 0, kind: input, shape index: {}]   ;;  %s235_s1 = inlined_call_operand.hbm [shape: f32[16,128], index: 1, kind: input, shape index: {}]   ;;  %s236_s2 = inlined_call_operand.hbm [shape: f32[1,1,1], index: 2, kind: output, shape index: {}]  }
   0x1   :  { %8 = vsyncpa [#allocation7], 0 }
   0x2   :  { %9 = vsyncpa [#allocation5], 0  ;;  %s178_s9 = smov [#allocation3]   ;;  %s106_s13 = scalar_lea.hbm %s234_s0, 256 }
   0x3   :  { %s19_s10 = sshll.u32 %s178_s9, 4  ;;  %p107_p0 = scmp.ne.s32.totalorder %s234_s0, %s106_s13  ;;  %s20_s10 = int_to_ptr.vmem [resolvable:$true] %s19_s10 }
   0x4   :  { %p110_p1 = scmp.lt.u32.totalorder %s106_s13, %s234_s0 }
   0x6   :  { %p112_p2 = pnand %p110_p1, %p107_p0 }
   0x8   :  { %115 = shalt.err (!%p112_p2)
}
   0x9   :  { %s116_s18 = scalar_lea.vmem %s20_s10, 256  ;;  %p121_p4 = scmp.lt.s32.totalorder %s20_s10, %s20_s10 }
   0xa   :  { %p117_p3 = scmp.ne.s32.totalorder %s20_s10, %s116_s18  ;;  %p122_p5 = scmp.lt.s32.totalorder %s116_s18, %s116_s18 }
   0xc   :  { %p123_p6 = por %p122_p5, %p121_p4 }
   0xe   :  { %p124_p7 = pnand %p123_p6, %p117_p3 }
  0x10   :  { %127 = shalt.err (!%p124_p7)
}
  0x11   :  { %s179_s19 = smov 128   ;;  %s180_s20 = smov 8  }
  0x12   :  { %25 = dma.hbm_to_vmem [thread:$0]  %s234_s0, 256, %s20_s10, [#allocation4], %s179_s19, %s179_s19, %s180_s20  }
  0x13   :  { %s181_s23 = smov [#allocation6]   ;;  %s128_s27 = scalar_lea.hbm %s235_s1, 256 }
  0x14   :  { %s35_s24 = sshll.u32 %s181_s23, 4  ;;  %p129_p8 = scmp.ne.s32.totalorder %s235_s1, %s128_s27  ;;  %s36_s24 = int_to_ptr.vmem [resolvable:$true] %s35_s24 }
  0x15   :  { %p132_p9 = scmp.lt.u32.totalorder %s128_s27, %s235_s1 }
  0x17   :  { %p134_p10 = pnand %p132_p9, %p129_p8 }
  0x19   :  { %137 = shalt.err (!%p134_p10)
}
  0x1a   :  { %s138_s4 = scalar_lea.vmem %s36_s24, 256  ;;  %p143_p12 = scmp.lt.s32.totalorder %s36_s24, %s36_s24 }
  0x1b   :  { %p139_p11 = scmp.ne.s32.totalorder %s36_s24, %s138_s4  ;;  %p144_p13 = scmp.lt.s32.totalorder %s138_s4, %s138_s4 }
  0x1d   :  { %p145_p0 = por %p144_p13, %p143_p12 }
  0x1f   :  { %p146_p1 = pnand %p145_p0, %p139_p11 }
  0x21   :  { %149 = shalt.err (!%p146_p1)
}
  0x22   :  { %41 = dma.hbm_to_vmem [thread:$0]  %s235_s1, 256, %s36_s24, [#allocation7], %s179_s19, %s179_s19, %s180_s20  }
  0x23   :  { %172 = dma.done.wait [#allocation4], 256  }
  0x24   :  { %173 = vsyncadd [#allocation4], 4294967040 }
  0x25   :  { %174 = dma.done.wait [#allocation7], 256  }
  0x26   :  { %175 = vsyncadd [#allocation7], 4294967040  ;;  %v57_v0 = vld [vmem:[#allocation6] sm:$0xff]  ;;  %v58_v1 = vld [vmem:[#allocation6 + $0x8] sm:$0xff]  ;;  %s182_s1 = smov [#allocation8]   ;;  %vm81_vm0 = vcmask 0  }
  0x27   :  { %v59_v2 = vld [vmem:[#allocation3] sm:$0xff]  ;;  %v60_v3 = vld [vmem:[#allocation3 + $0x8] sm:$0xff]  ;;  %s89_s6 = sshll.u32 %s182_s1, 4  ;;  %s90_s6 = int_to_ptr.vmem [resolvable:$true] %s89_s6 }
  0x28   :  { %v61_v4 = vsub.f32 %v57_v0, %v59_v2  ;;  %v62_v5 = vsub.f32 %v58_v1, %v60_v3  ;;  %s150_s8 = scalar_lea.vmem %s90_s6, 16  ;;  %s154_s9 = scalar_lea.vmem %s90_s6, 32 }
  0x29   :  { %p151_p2 = scmp.ne.s32.totalorder %s90_s6, %s150_s8  ;;  %p155_p3 = scmp.lt.s32.totalorder %s90_s6, %s90_s6 }
  0x2a   :  { %v64_v6 = vadd.f32 %v62_v5, %v61_v4  ;;  %p156_p4 = scmp.lt.s32.totalorder %s154_s9, %s150_s8 }
  0x2c   :  { %71 = vadd.xlane.f32.xlu0 %v64_v6  ;;  %p157_p5 = por %p156_p4, %p155_p3 }
  0x2e   :  { %p158_p6 = pnand %p157_p5, %p151_p2 }
  0xb9   :  { %v72_v7 = vpop.xlane.xlu0 %71 }
  0xba   :  { %v73_v8 = vrot.slane %v72_v7, 4 }
  0xbc   :  { %v74_v9 = vadd.f32 %v73_v8, %v72_v7 }
  0xbe   :  { %v75_v10 = vrot.slane %v74_v9, 2 }
  0xc0   :  { %v76_v11 = vadd.f32 %v75_v10, %v74_v9 }
  0xc2   :  { %v77_v12 = vrot.slane %v76_v11, 1 }
  0xc4   :  { %v78_v13 = vadd.f32 %v77_v12, %v76_v11 }
  0xc6   :  { %99 = vpush %v78_v13 }
  0xf7   :  { %s100_s7 = spop %99 }
  0xf8   :  { %v80_v14 = vstv %s100_s7 }
  0xf9   :  { %82 = vst.msk [vmem:[#allocation8] sm:$0x1] %vm81_vm0, %v80_v14 }
  0xfa   :  { %161 = shalt.err (!%p158_p6)
}
  0xfb   :  { %s162_s12 = scalar_lea.hbm %s236_s2, 16 }
  0xfc   :  { %p163_p7 = scmp.ne.s32.totalorder %s236_s2, %s162_s12  ;;  %p166_p8 = scmp.lt.u32.totalorder %s162_s12, %s236_s2 }
  0xfe   :  { %p168_p9 = pnand %p166_p8, %p163_p7 }
 0x100   :  { %171 = shalt.err (!%p168_p9)
}
 0x101   :  { %92 = dma.vmem_to_hbm [thread:$0]  %s90_s6, 16, %s236_s2, [#allocation5]  }
 0x102   :  { %176 = dma.done.wait [#allocation5], 16  }
 0x103   :  { %177 = vsyncadd [#allocation5], 4294967280 }
 0x104   :  { %96 = vsyncpa [#allocation4], 1 }
 0x105   :  { %97 = vsyncpa [#allocation7], 1 }
 0x106   :  { %98 = vsyncpa [#allocation5], 1 }

</bundles_post_ra>
